<compile_context>
chip_gen: v7x
topology: tpu7x:2x2x1
jax: 0.10.0
libtpu: 0.0.40
codegen_flags: <defaults>
</compile_context>

<pallas_src>
import functools
import math

import jax
import jax.numpy as jnp
from jax.experimental import pallas as pl
from jax.experimental.pallas import tpu as pltpu

HIDDEN = 64
FUSED = 2 * HIDDEN          # 128: actor | critic lanes -> fills one vreg width
VALUE_COL = FUSED - 1       # critic value parked in the last fused lane
OUT_W = 8                   # packed output lanes: [logp, value, entropy, 0, ...]
_LOG_2PI = math.log(2.0 * math.pi)


def _round_up(x, m):
    return ((x + m - 1) // m) * m


def _fused_trunk(state, w1, b1, w2, b2, w3, b3, compute_dtype):
    """Three fused 128-wide MXU matmuls; f32 accumulate, f32 bias + tanh."""
    x = state.astype(compute_dtype)
    h1 = jnp.tanh(jnp.dot(x, w1[...], preferred_element_type=jnp.float32) + b1[...])
    h2 = jnp.tanh(jnp.dot(h1.astype(compute_dtype), w2[...],
                          preferred_element_type=jnp.float32) + b2[...])
    h3 = jnp.dot(h2.astype(compute_dtype), w3[...],
                 preferred_element_type=jnp.float32) + b3[...]
    return h3   # (TB, 128): cols [0:A] actor head pre-activation, col 127 critic value


def continuous_eval_kernel(action_dim, compute_dtype,
                           state_ref, action_ref, inv_var_ref, logp_const_ref,
                           w1, b1, w2, b2, w3, b3, out_ref):
    """Continuous env: actor ends in Tanh; dist = MultivariateNormal(mean, diag(var)).

    inv_var / logdet / entropy are batch constants precomputed in the wrapper.
    """
    A = action_dim
    h3 = _fused_trunk(state_ref[...], w1, b1, w2, b2, w3, b3, compute_dtype)

    mean = jnp.tanh(h3[:, :A])                                          # (TB, A)
    diff = action_ref[...] - mean
    maha = jnp.sum(diff * diff * inv_var_ref[...], axis=-1, keepdims=True)  # (TB, 1)
    logp = -0.5 * maha + logp_const_ref[...]                            # (TB, 1)
    value = h3[:, VALUE_COL:VALUE_COL + 1]                              # (TB, 1) lane slice

    lane = jax.lax.broadcasted_iota(jnp.int32, out_ref.shape, 1)        # (TB, 8): cheap
    out_ref[...] = (jnp.where(lane == 0, logp, 0.0)
                    + jnp.where(lane == 1, value, 0.0))


def discrete_eval_kernel(n_actions, compute_dtype,
                         state_ref, action_ref,
                         w1, b1, w2, b2, w3, b3, out_ref):
    """Discrete env: actor ends in Softmax(dim=-1); dist = Categorical(probs)."""
    A = n_actions
    h3 = _fused_trunk(state_ref[...], w1, b1, w2, b2, w3, b3, compute_dtype)

    logits = h3[:, :A]                                                  # (TB, A)
    m = jnp.max(logits, axis=-1, keepdims=True)
    z = logits - m
    denom = jnp.sum(jnp.exp(z), axis=-1, keepdims=True)
    logprobs = z - jnp.log(denom)            # log-softmax: numerically safe
    probs = jnp.exp(logprobs)

    act_idx = action_ref[...]                                           # (TB, 1) int32
    lane_a = jax.lax.broadcasted_iota(jnp.int32, logits.shape, 1)
    onehot = (lane_a == act_idx).astype(jnp.float32)
    logp = jnp.sum(logprobs * onehot, axis=-1, keepdims=True)           # (TB, 1)
    ent = -jnp.sum(probs * logprobs, axis=-1, keepdims=True)            # (TB, 1)
    value = h3[:, VALUE_COL:VALUE_COL + 1]                              # (TB, 1)

    lane = jax.lax.broadcasted_iota(jnp.int32, out_ref.shape, 1)
    out_ref[...] = (jnp.where(lane == 0, logp, 0.0)
                    + jnp.where(lane == 1, value, 0.0)
                    + jnp.where(lane == 2, ent, 0.0))


def _fuse_params(params, compute_dtype):
    """Pack 12 actor/critic weights into 3 fused 128-wide layers (6 arrays)."""
    (aw1, ab1, aw2, ab2, aw3, ab3, cw1, cb1, cw2, cb2, cw3, cb3) = params
    A = aw3.shape[1]
    assert A <= FUSED - 1, "fused head layout assumes action_dim <= 127"
    w1 = jnp.concatenate([aw1, cw1], axis=1)                            # (S, 128)
    b1 = jnp.concatenate([ab1, cb1], axis=1)                            # (1, 128)
    w2 = jnp.zeros((FUSED, FUSED), jnp.float32)
    w2 = w2.at[:HIDDEN, :HIDDEN].set(aw2).at[HIDDEN:, HIDDEN:].set(cw2)
    b2 = jnp.concatenate([ab2, cb2], axis=1)
    w3 = jnp.zeros((FUSED, FUSED), jnp.float32)
    w3 = w3.at[:HIDDEN, :A].set(aw3).at[HIDDEN:, VALUE_COL:VALUE_COL + 1].set(cw3)
    b3 = jnp.zeros((1, FUSED), jnp.float32)
    b3 = b3.at[:, :A].set(ab3).at[:, VALUE_COL:VALUE_COL + 1].set(cb3)
    # MXU operands in compute_dtype (bf16 default); biases stay f32.
    return (w1.astype(compute_dtype), b1, w2.astype(compute_dtype), b2,
            w3.astype(compute_dtype), b3)


def _pallas_eval(kernel, row_arrays, const_arrays, B, *,
                 block_b, flops_per_row, transc_per_row):
    """Batch-tiled grid: row arrays tiled (TB, .), const arrays resident full-array.

    No input padding: grid = cdiv(B, TB); Pallas masks the ragged last block.
    """
    TB = min(block_b, _round_up(max(B, 1), 8))
    grid = (pl.cdiv(B, TB),)

    row_specs = []
    for a in row_arrays:
        if a.shape[1] >= 256:
            # Deep-buffer the one sizable streamed input (per perf review).
            spec = pl.BlockSpec((TB, a.shape[1]), lambda i: (i, 0),
                                pipeline_mode=pl.Buffered(3))
        else:
            spec = pl.BlockSpec((TB, a.shape[1]), lambda i: (i, 0))
        row_specs.append(spec)
    const_specs = [pl.BlockSpec(a.shape, lambda i: (0, 0)) for a in const_arrays]

    bytes_accessed = int(sum(a.size * a.dtype.itemsize for a in row_arrays)
                         + sum(a.size * a.dtype.itemsize for a in const_arrays)
                         + B * OUT_W * 4)

    out = pl.pallas_call(
        kernel,
        out_shape=jax.ShapeDtypeStruct((B, OUT_W), jnp.float32),
        grid_spec=pltpu.PrefetchScalarGridSpec(
            num_scalar_prefetch=0,
            grid=grid,
            in_specs=row_specs + const_specs,
            out_specs=pl.BlockSpec((TB, OUT_W), lambda i: (i, 0)),
        ),
        compiler_params=pltpu.CompilerParams(
            # v7x: the batch axis can shard across the 2 TensorCores; tune
            # block_b down if B/TB < 4 so both cores get work.
            dimension_semantics=("parallel",)),
        cost_estimate=pl.CostEstimate(
            flops=int(B * flops_per_row),
            transcendentals=int(B * transc_per_row),
            bytes_accessed=bytes_accessed),
    )(*row_arrays, *const_arrays)
    return out


def evaluate_continuous(state, action, action_var, params, *,
                        compute_dtype=jnp.bfloat16, block_b=2048):
    """evaluate(state, action): returns (logprobs (B,), values (B,1), entropy (B,))."""
    B, state_dim = state.shape
    A = action.shape[1]
    fused = _fuse_params(params, compute_dtype)

    # Batch-constant distribution stats: computed once, exactly, in f32.
    var = jnp.asarray(action_var, jnp.float32).reshape(1, A)
    inv_var = (1.0 / var).astype(jnp.float32)
    logdet = jnp.sum(jnp.log(var))
    logp_const = jnp.reshape(-0.5 * (logdet + A * _LOG_2PI), (1, 1)).astype(jnp.float32)
    entropy = jnp.broadcast_to(0.5 * (A * (1.0 + _LOG_2PI) + logdet), (B,))

    kernel = functools.partial(continuous_eval_kernel, A, compute_dtype)
    flops_per_row = 2 * (state_dim * FUSED + 2 * FUSED * FUSED)
    transc_per_row = 2 * FUSED + A
    out = _pallas_eval(kernel, [state, action], [inv_var, logp_const, *fused], B,
                       block_b=block_b, flops_per_row=flops_per_row,
                       transc_per_row=transc_per_row)
    return out[:, 0], out[:, 1:2], entropy


def evaluate_discrete(state, action_idx, params, *,
                      compute_dtype=jnp.bfloat16, block_b=2048):
    B, state_dim = state.shape
    A = params[4].shape[1]                         # aw3: (HIDDEN, n_actions)
    fused = _fuse_params(params, compute_dtype)
    kernel = functools.partial(discrete_eval_kernel, A, compute_dtype)
    action_idx = jnp.reshape(action_idx, (B, 1)).astype(jnp.int32)
    flops_per_row = 2 * (state_dim * FUSED + 2 * FUSED * FUSED)
    transc_per_row = 2 * FUSED + 3 * A
    out = _pallas_eval(kernel, [state, action_idx], list(fused), B,
                       block_b=block_b, flops_per_row=flops_per_row,
                       transc_per_row=transc_per_row)
    return out[:, 0], out[:, 1:2], out[:, 2]


def init_params(key, state_dim, action_dim):
    """PyTorch-style Linear init (uniform +/- 1/sqrt(fan_in)), weights stored [in, out]."""
    dims = [(state_dim, HIDDEN), (HIDDEN, HIDDEN), (HIDDEN, action_dim),   # actor
            (state_dim, HIDDEN), (HIDDEN, HIDDEN), (HIDDEN, 1)]            # critic
    params = []
    for (fan_in, fan_out) in dims:
        key, kw, kb = jax.random.split(key, 3)
        bound = 1.0 / jnp.sqrt(jnp.float32(fan_in))
        w = jax.random.uniform(kw, (fan_in, fan_out), jnp.float32, -bound, bound)
        b = jax.random.uniform(kb, (1, fan_out), jnp.float32, -bound, bound)
        params += [w, b]
    return params


def _ref_continuous(state, action, var, p):
    aw1, ab1, aw2, ab2, aw3, ab3, cw1, cb1, cw2, cb2, cw3, cb3 = p
    h = jnp.tanh(state @ aw1 + ab1)
    h = jnp.tanh(h @ aw2 + ab2)
    mean = jnp.tanh(h @ aw3 + ab3)
    c = jnp.tanh(state @ cw1 + cb1)
    c = jnp.tanh(c @ cw2 + cb2)
    value = c @ cw3 + cb3
    k = mean.shape[-1]
    diff = action - mean
    maha = jnp.sum(diff * diff / var, axis=-1)
    logdet = jnp.sum(jnp.log(var))
    logp = -0.5 * (maha + logdet + k * _LOG_2PI)
    ent = jnp.full((state.shape[0],), 0.5 * (k * (1.0 + _LOG_2PI) + logdet))
    return logp, value, ent


def _ref_discrete(state, act_idx, p):
    aw1, ab1, aw2, ab2, aw3, ab3, cw1, cb1, cw2, cb2, cw3, cb3 = p
    h = jnp.tanh(state @ aw1 + ab1)
    h = jnp.tanh(h @ aw2 + ab2)
    logits = h @ aw3 + ab3
    logprobs = jax.nn.log_softmax(logits, axis=-1)
    probs = jnp.exp(logprobs)
    c = jnp.tanh(state @ cw1 + cb1)
    c = jnp.tanh(c @ cw2 + cb2)
    value = c @ cw3 + cb3
    logp = jnp.take_along_axis(logprobs, act_idx[:, None], axis=-1)[:, 0]
    ent = -jnp.sum(probs * logprobs, axis=-1)
    return logp, value, ent


if __name__ == "__main__":
    key = jax.random.PRNGKey(0)
    B, STATE_DIM, ACTION_DIM = 8, 16, 4
    action_std_init = 0.6

    (k_state, k_action, k_params, k_params_d,
     k_actdisc, k_ragged) = jax.random.split(key, 6)
    state = jax.random.normal(k_state, (B, STATE_DIM), jnp.float32)
    action = jax.random.normal(k_action, (B, ACTION_DIM), jnp.float32)
    action_var = jnp.full((1, ACTION_DIM), action_std_init * action_std_init, jnp.float32)

    # --- continuous-action branch (MultivariateNormal with diagonal covariance) ---
    params_c = init_params(k_params, STATE_DIM, ACTION_DIM)
    logp_r, value_r, ent_r = _ref_continuous(state, action, action_var, params_c)

    # f32 MXU path: tight correctness check.
    logp, value, ent = evaluate_continuous(state, action, action_var, params_c,
                                           compute_dtype=jnp.float32)
    jax.block_until_ready((logp, value, ent))
    assert jnp.allclose(logp, logp_r, atol=2e-4, rtol=1e-4), "f32 logprob mismatch"
    assert jnp.allclose(value, value_r, atol=2e-4, rtol=1e-4), "f32 value mismatch"
    assert jnp.allclose(ent, ent_r, atol=2e-4, rtol=1e-4), "f32 entropy mismatch"

    # Default bf16 MXU path (recommended on v5e/v6e/v7x): loose sanity bound.
    # TODO(synk): if PPO ratio exp(logp - old_logp) proves bf16-sensitive, pass
    # compute_dtype=jnp.float32 (or keep only the head matmul f32).
    logp_b, value_b, ent_b = evaluate_continuous(state, action, action_var, params_c)
    jax.block_until_ready((logp_b, value_b, ent_b))
    assert jnp.allclose(logp_b, logp_r, atol=0.3, rtol=5e-2), "bf16 logprob mismatch"
    assert jnp.allclose(value_b, value_r, atol=0.1, rtol=5e-2), "bf16 value mismatch"
    assert jnp.allclose(ent_b, ent_r, atol=1e-5), "bf16 entropy mismatch"

    # Ragged batch (grid = cdiv, no wrapper padding): B not a multiple of the tile.
    B2 = 20
    state2 = jax.random.normal(k_ragged, (B2, STATE_DIM), jnp.float32)
    action2 = jax.random.normal(jax.random.fold_in(k_ragged, 1), (B2, ACTION_DIM),
                                jnp.float32)
    logp2, value2, _ = evaluate_continuous(state2, action2, action_var, params_c,
                                           compute_dtype=jnp.float32, block_b=16)
    jax.block_until_ready((logp2, value2))
    logp2_r, value2_r, _ = _ref_continuous(state2, action2, action_var, params_c)
    assert jnp.allclose(logp2, logp2_r, atol=2e-4, rtol=1e-4), "ragged logprob mismatch"
    assert jnp.allclose(value2, value2_r, atol=2e-4, rtol=1e-4), "ragged value mismatch"

    # --- discrete-action branch (Categorical over softmax probs) ---
    N_ACTIONS = 6
    params_d = init_params(k_params_d, STATE_DIM, N_ACTIONS)
    action_idx = jax.random.randint(k_actdisc, (B,), 0, N_ACTIONS)
    logp_dr, value_dr, ent_dr = _ref_discrete(state, action_idx, params_d)

    logp_d, value_d, ent_d = evaluate_discrete(state, action_idx, params_d,
                                               compute_dtype=jnp.float32)
    jax.block_until_ready((logp_d, value_d, ent_d))
    assert jnp.allclose(logp_d, logp_dr, atol=2e-4, rtol=1e-4), "disc logprob mismatch"
    assert jnp.allclose(value_d, value_dr, atol=2e-4, rtol=1e-4), "disc value mismatch"
    assert jnp.allclose(ent_d, ent_dr, atol=2e-4, rtol=1e-4), "disc entropy mismatch"

    logp_db, value_db, ent_db = evaluate_discrete(state, action_idx, params_d)
    jax.block_until_ready((logp_db, value_db, ent_db))
    assert jnp.allclose(logp_db, logp_dr, atol=0.1, rtol=5e-2), "disc bf16 logprob mismatch"
    assert jnp.allclose(value_db, value_dr, atol=0.1, rtol=5e-2), "disc bf16 value mismatch"
    assert jnp.allclose(ent_db, ent_dr, atol=0.1, rtol=5e-2), "disc bf16 entropy mismatch"

    print("KERNEL_OK")
</pallas_src>

<mosaic_0001>
module attributes {stable_mosaic.version = 11 : i64} {
  func.func @continuous_eval_kernel(%arg0: i32, %arg1: memref<8x16xf32, #tpu.memory_space<vmem>>, %arg2: memref<8x4xf32, #tpu.memory_space<vmem>>, %arg3: memref<1x4xf32, #tpu.memory_space<vmem>>, %arg4: memref<1x1xf32, #tpu.memory_space<vmem>>, %arg5: memref<16x128xf32, #tpu.memory_space<vmem>>, %arg6: memref<1x128xf32, #tpu.memory_space<vmem>>, %arg7: memref<128x128xf32, #tpu.memory_space<vmem>>, %arg8: memref<1x128xf32, #tpu.memory_space<vmem>>, %arg9: memref<128x128xf32, #tpu.memory_space<vmem>>, %arg10: memref<1x128xf32, #tpu.memory_space<vmem>>, %arg11: memref<8x8xf32, #tpu.memory_space<vmem>>) attributes {dimension_semantics = [#tpu.dimension_semantics<parallel>], iteration_bounds = array<i64: 1>, scalar_prefetch = 0 : i64, scratch_operands = 0 : i64, tpu.core_type = #tpu.core_type<tc>, window_params = [{transform_indices = @transform_0, window_bounds = array<i64: 8, 16>}, {transform_indices = @transform_1, window_bounds = array<i64: 8, 4>}, {pipeline_mode = #tpu.pipeline_mode<synchronous>, transform_indices = @transform_2, window_bounds = array<i64: 1, 4>}, {pipeline_mode = #tpu.pipeline_mode<synchronous>, transform_indices = @transform_3, window_bounds = array<i64: 1, 1>}, {pipeline_mode = #tpu.pipeline_mode<synchronous>, transform_indices = @transform_4, window_bounds = array<i64: 16, 128>}, {pipeline_mode = #tpu.pipeline_mode<synchronous>, transform_indices = @transform_5, window_bounds = array<i64: 1, 128>}, {pipeline_mode = #tpu.pipeline_mode<synchronous>, transform_indices = @transform_6, window_bounds = array<i64: 128, 128>}, {pipeline_mode = #tpu.pipeline_mode<synchronous>, transform_indices = @transform_7, window_bounds = array<i64: 1, 128>}, {pipeline_mode = #tpu.pipeline_mode<synchronous>, transform_indices = @transform_8, window_bounds = array<i64: 128, 128>}, {pipeline_mode = #tpu.pipeline_mode<synchronous>, transform_indices = @transform_9, window_bounds = array<i64: 1, 128>}, {transform_indices = @transform_10, window_bounds = array<i64: 8, 8>}]} {
    %c0 = arith.constant 0 : index
    %c0_0 = arith.constant 0 : index
    %0 = vector.load %arg1[%c0, %c0_0] : memref<8x16xf32, #tpu.memory_space<vmem>>, vector<8x16xf32>
    %c0_1 = arith.constant 0 : index
    %c0_2 = arith.constant 0 : index
    %1 = vector.load %arg5[%c0_1, %c0_2] : memref<16x128xf32, #tpu.memory_space<vmem>>, vector<16x128xf32>
    %cst = arith.constant dense<0.000000e+00> : vector<8x128xf32>
    %2 = tpu.matmul %0, %1, %cst {dimension_numbers = #tpu.dot_dimension_numbers<[1], [0], [0], [1], [0, 0, 1, 1], [], []>} : vector<8x16xf32>, vector<16x128xf32>, vector<8x128xf32> -> vector<8x128xf32>
    %c0_3 = arith.constant 0 : index
    %c0_4 = arith.constant 0 : index
    %3 = vector.load %arg6[%c0_3, %c0_4] : memref<1x128xf32, #tpu.memory_space<vmem>>, vector<1x128xf32>
    %4 = vector.broadcast %3 : vector<1x128xf32> to vector<8x128xf32>
    %5 = arith.addf %2, %4 : vector<8x128xf32>
    %6 = math.tanh %5 : vector<8x128xf32>
    %c0_5 = arith.constant 0 : index
    %c0_6 = arith.constant 0 : index
    %7 = vector.load %arg7[%c0_5, %c0_6] : memref<128x128xf32, #tpu.memory_space<vmem>>, vector<128x128xf32>
    %cst_7 = arith.constant dense<0.000000e+00> : vector<8x128xf32>
    %8 = tpu.matmul %6, %7, %cst_7 {dimension_numbers = #tpu.dot_dimension_numbers<[1], [0], [0], [1], [0, 0, 1, 1], [], []>} : vector<8x128xf32>, vector<128x128xf32>, vector<8x128xf32> -> vector<8x128xf32>
    %c0_8 = arith.constant 0 : index
    %c0_9 = arith.constant 0 : index
    %9 = vector.load %arg8[%c0_8, %c0_9] : memref<1x128xf32, #tpu.memory_space<vmem>>, vector<1x128xf32>
    %10 = vector.broadcast %9 : vector<1x128xf32> to vector<8x128xf32>
    %11 = arith.addf %8, %10 : vector<8x128xf32>
    %12 = math.tanh %11 : vector<8x128xf32>
    %c0_10 = arith.constant 0 : index
    %c0_11 = arith.constant 0 : index
    %13 = vector.load %arg9[%c0_10, %c0_11] : memref<128x128xf32, #tpu.memory_space<vmem>>, vector<128x128xf32>
    %cst_12 = arith.constant dense<0.000000e+00> : vector<8x128xf32>
    %14 = tpu.matmul %12, %13, %cst_12 {dimension_numbers = #tpu.dot_dimension_numbers<[1], [0], [0], [1], [0, 0, 1, 1], [], []>} : vector<8x128xf32>, vector<128x128xf32>, vector<8x128xf32> -> vector<8x128xf32>
    %c0_13 = arith.constant 0 : index
    %c0_14 = arith.constant 0 : index
    %15 = vector.load %arg10[%c0_13, %c0_14] : memref<1x128xf32, #tpu.memory_space<vmem>>, vector<1x128xf32>
    %16 = vector.broadcast %15 : vector<1x128xf32> to vector<8x128xf32>
    %17 = arith.addf %14, %16 : vector<8x128xf32>
    %18 = vector.extract_strided_slice %17 {offsets = [0, 0], sizes = [8, 4], strides = [1, 1]} : vector<8x128xf32> to vector<8x4xf32>
    %19 = math.tanh %18 : vector<8x4xf32>
    %c0_15 = arith.constant 0 : index
    %c0_16 = arith.constant 0 : index
    %20 = vector.load %arg2[%c0_15, %c0_16] : memref<8x4xf32, #tpu.memory_space<vmem>>, vector<8x4xf32>
    %21 = arith.subf %20, %19 : vector<8x4xf32>
    %22 = arith.mulf %21, %21 : vector<8x4xf32>
    %c0_17 = arith.constant 0 : index
    %c0_18 = arith.constant 0 : index
    %23 = vector.load %arg3[%c0_17, %c0_18] : memref<1x4xf32, #tpu.memory_space<vmem>>, vector<1x4xf32>
    %24 = vector.broadcast %23 : vector<1x4xf32> to vector<8x4xf32>
    %25 = arith.mulf %22, %24 : vector<8x4xf32>
    %cst_19 = arith.constant dense<0.000000e+00> : vector<8xf32>
    %26 = vector.multi_reduction <add>, %25, %cst_19 [1] : vector<8x4xf32> to vector<8xf32>
    %27 = vector.shape_cast %26 : vector<8xf32> to vector<8x1xf32>
    %cst_20 = arith.constant -5.000000e-01 : f32
    %28 = vector.broadcast %cst_20 : f32 to vector<8x1xf32>
    %29 = arith.mulf %28, %27 : vector<8x1xf32>
    %c0_21 = arith.constant 0 : index
    %c0_22 = arith.constant 0 : index
    %30 = vector.load %arg4[%c0_21, %c0_22] : memref<1x1xf32, #tpu.memory_space<vmem>>, vector<1x1xf32>
    %31 = vector.broadcast %30 : vector<1x1xf32> to vector<8x1xf32>
    %32 = arith.addf %29, %31 : vector<8x1xf32>
    %33 = vector.extract_strided_slice %17 {offsets = [0, 127], sizes = [8, 1], strides = [1, 1]} : vector<8x128xf32> to vector<8x1xf32>
    %34 = tpu.iota {dimensions = array<i32: 1>} : vector<8x8xi32>
    %c0_i32 = arith.constant 0 : i32
    %35 = vector.broadcast %c0_i32 : i32 to vector<8x8xi32>
    %36 = arith.cmpi eq, %34, %35 : vector<8x8xi32>
    %cst_23 = arith.constant 0.000000e+00 : f32
    %37 = vector.shape_cast %32 : vector<8x1xf32> to vector<8x1xf32>
    %38 = vector.broadcast %37 : vector<8x1xf32> to vector<8x8xf32>
    %39 = vector.broadcast %cst_23 : f32 to vector<8x8xf32>
    %40 = arith.select %36, %38, %39 : vector<8x8xi1>, vector<8x8xf32>
    %c1_i32 = arith.constant 1 : i32
    %41 = vector.broadcast %c1_i32 : i32 to vector<8x8xi32>
    %42 = arith.cmpi eq, %34, %41 : vector<8x8xi32>
    %cst_24 = arith.constant 0.000000e+00 : f32
    %43 = vector.shape_cast %33 : vector<8x1xf32> to vector<8x1xf32>
    %44 = vector.broadcast %43 : vector<8x1xf32> to vector<8x8xf32>
    %45 = vector.broadcast %cst_24 : f32 to vector<8x8xf32>
    %46 = arith.select %42, %44, %45 : vector<8x8xi1>, vector<8x8xf32>
    %47 = arith.addf %40, %46 : vector<8x8xf32>
    %c0_25 = arith.constant 0 : index
    %c0_26 = arith.constant 0 : index
    %48 = vector.load %arg11[%c0_25, %c0_26] : memref<8x8xf32, #tpu.memory_space<vmem>>, vector<8x8xf32>
    tpu.vector_store %arg11[%c0_25, %c0_26], %47 {strides = array<i32>} : memref<8x8xf32, #tpu.memory_space<vmem>>, vector<8x8xf32>,
    return
  }
  func.func @transform_0(%arg0: i32) -> (i32, i32) {
    %c0_i32 = arith.constant 0 : i32
    %c0_i32_0 = arith.constant 0 : i32
    return %arg0, %c0_i32 : i32, i32
  }
  func.func @transform_1(%arg0: i32) -> (i32, i32) {
    %c0_i32 = arith.constant 0 : i32
    %c0_i32_0 = arith.constant 0 : i32
    return %arg0, %c0_i32 : i32, i32
  }
  func.func @transform_2(%arg0: i32) -> (i32, i32) {
    %c0_i32 = arith.constant 0 : i32
    %c0_i32_0 = arith.constant 0 : i32
    %c0_i32_1 = arith.constant 0 : i32
    return %c0_i32, %c0_i32_0 : i32, i32
  }
  func.func @transform_3(%arg0: i32) -> (i32, i32) {
    %c0_i32 = arith.constant 0 : i32
    %c0_i32_0 = arith.constant 0 : i32
    %c0_i32_1 = arith.constant 0 : i32
    return %c0_i32, %c0_i32_0 : i32, i32
  }
  func.func @transform_4(%arg0: i32) -> (i32, i32) {
    %c0_i32 = arith.constant 0 : i32
    %c0_i32_0 = arith.constant 0 : i32
    %c0_i32_1 = arith.constant 0 : i32
    return %c0_i32, %c0_i32_0 : i32, i32
  }
  func.func @transform_5(%arg0: i32) -> (i32, i32) {
    %c0_i32 = arith.constant 0 : i32
    %c0_i32_0 = arith.constant 0 : i32
    %c0_i32_1 = arith.constant 0 : i32
    return %c0_i32, %c0_i32_0 : i32, i32
  }
  func.func @transform_6(%arg0: i32) -> (i32, i32) {
    %c0_i32 = arith.constant 0 : i32
    %c0_i32_0 = arith.constant 0 : i32
    %c0_i32_1 = arith.constant 0 : i32
    return %c0_i32, %c0_i32_0 : i32, i32
  }
  func.func @transform_7(%arg0: i32) -> (i32, i32) {
    %c0_i32 = arith.constant 0 : i32
    %c0_i32_0 = arith.constant 0 : i32
    %c0_i32_1 = arith.constant 0 : i32
    return %c0_i32, %c0_i32_0 : i32, i32
  }
  func.func @transform_8(%arg0: i32) -> (i32, i32) {
    %c0_i32 = arith.constant 0 : i32
    %c0_i32_0 = arith.constant 0 : i32
    %c0_i32_1 = arith.constant 0 : i32
    return %c0_i32, %c0_i32_0 : i32, i32
  }
  func.func @transform_9(%arg0: i32) -> (i32, i32) {
    %c0_i32 = arith.constant 0 : i32
    %c0_i32_0 = arith.constant 0 : i32
    %c0_i32_1 = arith.constant 0 : i32
    return %c0_i32, %c0_i32_0 : i32, i32
  }
  func.func @transform_10(%arg0: i32) -> (i32, i32) {
    %c0_i32 = arith.constant 0 : i32
    %c0_i32_0 = arith.constant 0 : i32
    return %arg0, %c0_i32 : i32, i32
  }
}

</mosaic_0001>

<bundles_post_ra>
// kernel: tpu_custom_call.1
= control target key start
LH: loop header
LB: loop body
LE: loop exit
PB: predicated region body
PF: predicated region fallthrough
CT: control target
= control target key end

     0   :  { %s808_s0 = inlined_call_operand.vmem [shape: f32[8,16], index: 0, kind: input, shape index: {}]   ;;  %s809_s1 = inlined_call_operand.vmem [shape: f32[8,4], index: 1, kind: input, shape index: {}]   ;;  %s810_s2 = inlined_call_operand.vmem [shape: f32[1,4], index: 2, kind: input, shape index: {}]   ;;  %s811_s3 = inlined_call_operand.<no memory space> [shape: f32[1,1], index: 3, kind: input, shape index: {}]   ;;  %s812_s4 = inlined_call_operand.vmem [shape: f32[16,128], index: 4, kind: input, shape index: {}]   ;;  %s813_s5 = inlined_call_operand.vmem [shape: f32[1,128], index: 5, kind: input, shape index: {}]   ;;  %s814_s6 = inlined_call_operand.hbm [shape: f32[128,128], index: 6, kind: input, shape index: {}]   ;;  %s815_s7 = inlined_call_operand.vmem [shape: f32[1,128], index: 7, kind: input, shape index: {}]   ;;  %s816_s8 = inlined_call_operand.hbm [shape: f32[128,128], index: 8, kind: input, shape index: {}]   ;;  %s817_s9 = inlined_call_operand.vmem [shape: f32[1,128], index: 9, kind: input, shape index: {}]   ;;  %s818_s10 = inlined_call_operand.hbm [shape: f32[8,8], index: 10, kind: output, shape index: {}]  }
   0x1   :  { %v15_v0 = vstv %s811_s3 }
   0x2   :  { %16 = vst [vmem:[#allocation2] sm:$0x1] %v15_v0 }
   0x3   :  { %17 = vsyncpa [#allocation4], 0 }
   0x4   :  { %18 = vsyncpa [#allocation7], 0 }
   0x5   :  { %19 = vsyncpa [#allocation5], 0  ;;  %s660_s15 = smov [#allocation3]   ;;  %s588_s19 = scalar_lea.hbm %s814_s6, 2048 }
   0x6   :  { %s37_s16 = sshll.u32 %s660_s15, 4  ;;  %p589_p0 = scmp.ne.s32.totalorder %s814_s6, %s588_s19  ;;  %s38_s16 = int_to_ptr.vmem [resolvable:$true] %s37_s16 }
   0x7   :  { %p592_p1 = scmp.lt.u32.totalorder %s588_s19, %s814_s6 }
   0x9   :  { %p594_p2 = pnand %p592_p1, %p589_p0 }
   0xb   :  { %597 = shalt.err (!%p594_p2)
}
   0xc   :  { %s598_s3 = scalar_lea.vmem %s38_s16, 2048  ;;  %p603_p4 = scmp.lt.s32.totalorder %s38_s16, %s38_s16 }
   0xd   :  { %p599_p3 = scmp.ne.s32.totalorder %s38_s16, %s598_s3  ;;  %p604_p5 = scmp.lt.s32.totalorder %s598_s3, %s598_s3 }
   0xf   :  { %p605_p6 = por %p604_p5, %p603_p4 }
  0x11   :  { %p606_p7 = pnand %p605_p6, %p599_p3 }
  0x13   :  { %609 = shalt.err (!%p606_p7)
}
  0x14   :  { %s661_s24 = smov 128   ;;  %s662_s25 = smov 8  }
  0x15   :  { %43 = dma.hbm_to_vmem [thread:$0]  %s814_s6, 2048, %s38_s16, [#allocation4], %s661_s24, %s661_s24, %s662_s25  }
  0x16   :  { %s663_s28 = smov [#allocation6]   ;;  %s610_s12 = scalar_lea.hbm %s816_s8, 2048 }
  0x17   :  { %s51_s29 = sshll.u32 %s663_s28, 4  ;;  %p611_p8 = scmp.ne.s32.totalorder %s816_s8, %s610_s12  ;;  %s52_s29 = int_to_ptr.vmem [resolvable:$true] %s51_s29 }
  0x18   :  { %p614_p9 = scmp.lt.u32.totalorder %s610_s12, %s816_s8 }
  0x1a   :  { %p616_p10 = pnand %p614_p9, %p611_p8 }
  0x1c   :  { %619 = shalt.err (!%p616_p10)
}
  0x1d   :  { %s620_s18 = scalar_lea.vmem %s52_s29, 2048  ;;  %p625_p12 = scmp.lt.s32.totalorder %s52_s29, %s52_s29 }
  0x1e   :  { %p621_p11 = scmp.ne.s32.totalorder %s52_s29, %s620_s18  ;;  %p626_p13 = scmp.lt.s32.totalorder %s620_s18, %s620_s18 }
  0x20   :  { %p627_p0 = por %p626_p13, %p625_p12 }
  0x22   :  { %p628_p1 = pnand %p627_p0, %p621_p11 }
  0x24   :  { %631 = shalt.err (!%p628_p1)
}
  0x25   :  { %57 = dma.hbm_to_vmem [thread:$0]  %s816_s8, 2048, %s52_s29, [#allocation7], %s661_s24, %s661_s24, %s662_s25  }
  0x26   :  { %654 = dma.done.wait [#allocation4], 2048  }
  0x27   :  { %655 = vsyncadd [#allocation4], 4294965248 }
  0x28   :  { %656 = dma.done.wait [#allocation7], 2048  }
  0x29   :  { %657 = vsyncadd [#allocation7], 4294965248  ;;  %v664_v1 = vmov 0.0|0.0   ;;  %vm665_vm0 = vmmov 0   ;;  %v666_v2 = vmov 0.0   ;;  %v67_v3 = vld [vmem:[%s812_s4] sm:$0xff] }
  0x2a   :  { %518 = vmatprep.subr.bf16.mxu0 %v664_v1  ;;  %445 = vmatprep.mubr.msk.f32.mxu0 %vm665_vm0, %v666_v2  ;;  %v68_v4 = vld [vmem:[%s812_s4 + $0x8] sm:$0xff]  ;;  %v153_v8 = vld [vmem:[#allocation3 + $0x10] sm:$0xff]  ;;  %v154_v10 = vld [vmem:[#allocation3 + $0x18] sm:$0xff]  ;;  %vm76_vm1 = vcmask 130048   ;;  %vm350_vm2 = vcmask 31744   ;;  %vm380_vm5 = vcmask 64512  }
  0x2b   :  { %521 = vmatprep.subr.bf16.mxu1 %v664_v1  ;;  %480 = vmatprep.mubr.msk.f32.mxu1 %vm665_vm0, %v666_v2  ;;  %v519_v5 = vpack.c.bf16 %v68_v4, %v67_v3  ;;  %v151_v6 = vld [vmem:[#allocation3] sm:$0xff]  ;;  %v152_v7 = vld [vmem:[#allocation3 + $0x8] sm:$0xff]  ;;  %v525_v12 = vpack.c.bf16 %v154_v10, %v153_v8  ;;  %v157_v16 = vld [vmem:[#allocation3 + $0x30] sm:$0xff] }
  0x2c   :  { %v522_v9 = vpack.c.bf16 %v152_v7, %v151_v6  ;;  %v66_v11 = vld [vmem:[%s808_s0] sm:$0xff]  ;;  %v156_v14 = vld [vmem:[#allocation3 + $0x28] sm:$0xff]  ;;  %v161_v22 = vld [vmem:[#allocation3 + $0x50] sm:$0xff] }
  0x2d   :  { %520 = vmatpush3.bf16.msra.mxu0 %v519_v5  ;;  %v155_v13 = vld [vmem:[#allocation3 + $0x20] sm:$0xff]  ;;  %v158_v17 = vld [vmem:[#allocation3 + $0x38] sm:$0xff]  ;;  %v160_v20 = vld [vmem:[#allocation3 + $0x48] sm:$0xff] }
  0x2e   :  { %523 = vmatpush3.bf16.msra.mxu1 %v522_v9  ;;  %545 = vmatprep.subr.bf16.mxu0 %v664_v1  ;;  %v528_v15 = vpack.c.bf16 %v156_v14, %v155_v13  ;;  %v531_v18 = vpack.c.bf16 %v158_v17, %v157_v16  ;;  %v159_v19 = vld [vmem:[#allocation3 + $0x40] sm:$0xff]  ;;  %v162_v23 = vld [vmem:[#allocation3 + $0x58] sm:$0xff]  ;;  %v164_v26 = vld [vmem:[#allocation3 + $0x68] sm:$0xff]  ;;  %v668_v13 = vmov 0  }
  0x2f   :  { %524 = vmatprep.subr.bf16.mxu1 %v664_v1  ;;  %v534_v21 = vpack.c.bf16 %v160_v20, %v159_v19  ;;  %v537_v24 = vpack.c.bf16 %v162_v23, %v161_v22  ;;  %v163_v25 = vld [vmem:[#allocation3 + $0x60] sm:$0xff]  ;;  %v165_v28 = vld [vmem:[#allocation3 + $0x70] sm:$0xff]  ;;  %v166_v29 = vld [vmem:[#allocation3 + $0x78] sm:$0xff]  ;;  %579 = vset.pattern.permute.xlu0 %v668_v13 }
  0x30   :  { %446 = vmatmul.mubr.msk.f32.vlgmr.msra.gmra.mrb[0].mxu0 %vm76_vm1, %v66_v11  ;;  %v540_v27 = vpack.c.bf16 %v164_v26, %v163_v25  ;;  %v543_v30 = vpack.c.bf16 %v166_v29, %v165_v28  ;;  %v245_v31 = vld [vmem:[#allocation6] sm:$0xff]  ;;  %v246_v32 = vld [vmem:[#allocation6 + $0x8] sm:$0xff]  ;;  %v247_v33 = vld [vmem:[#allocation6 + $0x10] sm:$0xff] }
  0x31   :  { %515 = vmatprep.mubr.msk.f32.mxu0 %vm665_vm0, %v666_v2  ;;  %v546_v34 = vpack.c.bf16 %v246_v32, %v245_v31  ;;  %v248_v35 = vld [vmem:[#allocation6 + $0x18] sm:$0xff]  ;;  %v249_v37 = vld [vmem:[#allocation6 + $0x20] sm:$0xff]  ;;  %v250_v38 = vld [vmem:[#allocation6 + $0x28] sm:$0xff]  ;;  %v667_v2 = vmov 127  }
  0x32   :  { %526 = vmatpush3.bf16.msra.mxu1 %v525_v12  ;;  %v549_v36 = vpack.c.bf16 %v248_v35, %v247_v33  ;;  %v552_v39 = vpack.c.bf16 %v250_v38, %v249_v37  ;;  %v251_v40 = vld [vmem:[#allocation6 + $0x30] sm:$0xff]  ;;  %v252_v41 = vld [vmem:[#allocation6 + $0x38] sm:$0xff]  ;;  %v253_v43 = vld [vmem:[#allocation6 + $0x40] sm:$0xff]  ;;  %580 = vset.pattern.permute.xlu1 %v667_v2 }
  0x33   :  { %527 = vmatprep.subr.bf16.mxu1 %v664_v1  ;;  %547 = vmatpush3.bf16.msra.mxu0 %v546_v34  ;;  %v555_v42 = vpack.c.bf16 %v252_v41, %v251_v40  ;;  %v254_v44 = vld [vmem:[#allocation6 + $0x48] sm:$0xff]  ;;  %v398_v46 = vld [vmem:[%s813_s5] ss:$0 sm:$0xff]  ;;  %v255_v51 = vld [vmem:[#allocation6 + $0x50] sm:$0xff] }
  0x34   :  { %548 = vmatprep.subr.bf16.mxu0 %v664_v1  ;;  %v558_v45 = vpack.c.bf16 %v254_v44, %v253_v43  ;;  %v256_v52 = vld [vmem:[#allocation6 + $0x58] sm:$0xff]  ;;  %v257_v54 = vld [vmem:[#allocation6 + $0x60] sm:$0xff]  ;;  %v258_v55 = vld [vmem:[#allocation6 + $0x68] sm:$0xff] }
  0x35   :  { %v561_v53 = vpack.c.bf16 %v256_v52, %v255_v51  ;;  %v564_v56 = vpack.c.bf16 %v258_v55, %v257_v54  ;;  %v259_v57 = vld [vmem:[#allocation6 + $0x70] sm:$0xff]  ;;  %v260_v58 = vld [vmem:[#allocation6 + $0x78] sm:$0xff] }
  0x36   :  { %529 = vmatpush3.bf16.msra.mxu1 %v528_v15  ;;  %v567_v59 = vpack.c.bf16 %v260_v58, %v259_v57  ;;  %v400_v60 = vld [vmem:[%s815_s7] ss:$0 sm:$0xff] }
  0x37   :  { %530 = vmatprep.subr.bf16.mxu1 %v664_v1  ;;  %550 = vmatpush3.bf16.msra.mxu0 %v549_v36  ;;  %v401_v3 = vld [vmem:[%s817_s9] ss:$0 sm:$0xff] }
  0x38   :  { %551 = vmatprep.subr.bf16.mxu0 %v664_v1  ;;  %v339_v6 = vld [vmem:[%s809_s1] sm:$0xff]  ;;  %s669_s1 = smov [#allocation8]  }
  0x39   :  { %v402_v9 = vld [vmem:[%s810_s2] ss:$0 sm:$0xff]  ;;  %s388_s2 = sshll.u32 %s669_s1, 4  ;;  %s389_s2 = int_to_ptr.vmem [resolvable:$true] %s388_s2 }
  0x3a   :  { %532 = vmatpush3.bf16.msra.mxu1 %v531_v18  ;;  %v403_v14 = vld [vmem:[#allocation2] ss:$0 sm:$0xff]  ;;  %v363_v18 = vlaneseq  ;;  %s632_s9 = scalar_lea.vmem %s389_s2, 128  ;;  %p637_p3 = scmp.lt.s32.totalorder %s389_s2, %s389_s2 }
  0x3b   :  { %533 = vmatprep.subr.bf16.mxu1 %v664_v1  ;;  %553 = vmatpush3.bf16.msra.mxu0 %v552_v39  ;;  %p633_p2 = scmp.ne.s32.totalorder %s389_s2, %s632_s9  ;;  %p638_p4 = scmp.lt.s32.totalorder %s632_s9, %s632_s9 }
  0x3c   :  { %554 = vmatprep.subr.bf16.mxu0 %v664_v1  ;;  %v364_v19 = vand.u32 127, %v363_v18 }
  0x3d   :  { %p639_p5 = por %p638_p4, %p637_p3 }
  0x3e   :  { %535 = vmatpush3.bf16.msra.mxu1 %v534_v21  ;;  %vm372_vm3 = vcmp.eq.s32.totalorder %v364_v19, 1  ;;  %vm365_vm4 = vcmp.eq.s32.totalorder %v364_v19, 0 }
  0x3f   :  { %536 = vmatprep.subr.bf16.mxu1 %v664_v1  ;;  %556 = vmatpush3.bf16.msra.mxu0 %v555_v42  ;;  %p640_p6 = pnand %p639_p5, %p633_p2 }
  0x40   :  { %557 = vmatprep.subr.bf16.mxu0 %v664_v1 }
  0x42   :  { %538 = vmatpush3.bf16.msra.mxu1 %v537_v24 }
  0x43   :  { %539 = vmatprep.subr.bf16.mxu1 %v664_v1  ;;  %559 = vmatpush3.bf16.msra.mxu0 %v558_v45 }
  0x44   :  { %560 = vmatprep.subr.bf16.mxu0 %v664_v1 }
  0x46   :  { %541 = vmatpush3.bf16.msra.mxu1 %v540_v27 }
  0x47   :  { %542 = vmatprep.subr.bf16.mxu1 %v664_v1  ;;  %562 = vmatpush3.bf16.msra.mxu0 %v561_v53 }
  0x48   :  { %563 = vmatprep.subr.bf16.mxu0 %v664_v1 }
  0x4a   :  { %544 = vmatpush3.bf16.msra.mxu1 %v543_v30 }
  0x4b   :  { %565 = vmatpush3.bf16.msra.mxu0 %v564_v56 }
  0x4c   :  { %566 = vmatprep.subr.bf16.mxu0 %v664_v1 }
  0x4f   :  { %568 = vmatpush3.bf16.msra.mxu0 %v567_v59 }
 0x103   :  { %v146_v47 = vpop.f32.mrb[0].mxu0 }
 0x104   :  { %v147_v48 = vadd.f32 %v398_v46, %v146_v47  ;;  %v447_v49 = vpop.f32.mrb[1].mxu0 }
 0x106   :  { %582 = vtanh.f32 %v147_v48 }
 0x110   :  { %v583_v50 = vpop.eup %582 }
 0x111   :  { %481 = vmatmul.mubr.f32.vlgmr.msra.gmra.mrb[0].mxu1 %v583_v50 }
 0x1e4   :  { %v240_v61 = vpop.f32.mrb[0].mxu1 }
 0x1e5   :  { %v241_v62 = vadd.f32 %v400_v60, %v240_v61  ;;  %v482_v63 = vpop.f32.mrb[1].mxu1 }
 0x1e7   :  { %584 = vtanh.f32 %v241_v62 }
 0x1f1   :  { %v585_v0 = vpop.eup %584 }
 0x1f2   :  { %516 = vmatmul.mubr.f32.vlgmr.msra.gmra.mrb[2].mxu0 %v585_v0 }
 0x2c5   :  { %v334_v4 = vpop.f32.mrb[2].mxu0 }
 0x2c6   :  { %v335_v5 = vadd.f32 %v401_v3, %v334_v4  ;;  %v517_v1 = vpop.f32.mrb[3].mxu0 }
 0x2c8   :  { %586 = vtanh.f32 %v335_v5  ;;  %375 = vperm.xlu1 %580, %v335_v5  }
 0x2d2   :  { %v587_v7 = vpop.eup %586 }
 0x2d3   :  { %v340_v8 = vsub.f32 %v339_v6, %v587_v7 }
 0x2d5   :  { %v341_v10 = vmul.f32 %v340_v8, %v340_v8 }
 0x2d7   :  { %v349_v11 = vmul.f32 %v402_v9, %v341_v10 }
 0x2d9   :  { %v351_v12 = vsel %vm350_vm2, %v349_v11, 0.0 }
 0x2da   :  { %352 = vadd.xlane.f32.xlu0 %v351_v12 }
 0x347   :  { %v376_v20 = vpop.permute.xlu1 %375 }
 0x348   :  { %v378_v22 = vsel %vm372_vm3, %v376_v20, 0.0 }
 0x367   :  { %v353_v15 = vpop.xlane.xlu0 %352 }
 0x368   :  { %v354_v16 = vmul.f32 -0.5, %v353_v15 }
 0x36a   :  { %v362_v17 = vadd.f32 %v403_v14, %v354_v16 }
 0x36c   :  { %368 = vperm.xlu0 %579, %v362_v17  }
 0x370   :  { %581 = vset.pattern.permute.xlu0 %v667_v2 }
 0x3eb   :  { %v369_v21 = vpop.permute.xlu0 %368 }
 0x3ec   :  { %v371_v23 = vsel %vm365_vm4, %v369_v21, 0.0 }
 0x3ed   :  { %v379_v24 = vadd.f32 %v378_v22, %v371_v23 }
 0x3ef   :  { %381 = vst.msk [vmem:[#allocation8] sm:$0xff] %vm380_vm5, %v379_v24 }
 0x3f0   :  { %643 = shalt.err (!%p640_p6)
}
 0x3f1   :  { %s644_s11 = scalar_lea.hbm %s818_s10, 128 }
 0x3f2   :  { %p645_p7 = scmp.ne.s32.totalorder %s818_s10, %s644_s11  ;;  %p648_p8 = scmp.lt.u32.totalorder %s644_s11, %s818_s10 }
 0x3f4   :  { %p650_p9 = pnand %p648_p8, %p645_p7 }
 0x3f6   :  { %653 = shalt.err (!%p650_p9)
}
 0x3f7   :  { %391 = dma.vmem_to_hbm [thread:$0]  %s389_s2, 128, %s818_s10, [#allocation5]  }
 0x3f8   :  { %658 = dma.done.wait [#allocation5], 128  }
 0x3f9   :  { %659 = vsyncadd [#allocation5], 4294967168 }
 0x3fa   :  { %395 = vsyncpa [#allocation4], 1 }
 0x3fb   :  { %396 = vsyncpa [#allocation7], 1 }
 0x3fc   :  { %397 = vsyncpa [#allocation5], 1 }

</bundles_post_ra>
